<compile_context>
chip_gen: v7x
topology: tpu7x:2x2x1
jax: 0.10.0
libtpu: 0.0.40
codegen_flags: <defaults>
</compile_context>

<pallas_src>
import jax
import jax.numpy as jnp
from jax.experimental import pallas as pl
from jax.experimental.pallas import tpu as pltpu


def _round_up(x, m):
    return (x + m - 1) // m * m


def mlp_kernel(x_ref, w1_ref, b1_ref, w2_ref, b2_ref, o_ref):
    # In-kernel cast of the streamed x tile to the weight dtype (VPU, hidden
    # under the MXU/DMA); accumulation is f32 on the MXU.
    x = x_ref[...].astype(w1_ref.dtype)
    h = jnp.dot(x, w1_ref[...], preferred_element_type=jnp.float32)
    h = jnp.tanh(h + b1_ref[...])
    out = jnp.dot(h.astype(w2_ref.dtype), w2_ref[...],
                  preferred_element_type=jnp.float32)
    out = out + b2_ref[...]
    # (1 + tanh(out)) / 2 : one EUP transcendental + one VPU FMA.
    o_ref[...] = (0.5 * (1.0 + jnp.tanh(out))).astype(o_ref.dtype)


def _choose_tb(batch, *, max_tb=2048, min_tile=16):
    """Batch tile: multiple of 16 (full bf16 vreg packing), single grid step
    whenever the whole batch fits in one tile (tiny steps are pure per-step
    overhead), capped at max_tb rows for large batches."""
    b = _round_up(max(batch, min_tile), min_tile)
    return min(b, max_tb)


def prepare_params(w1, b1, w2, b2, compute_dtype=jnp.bfloat16):
    """One-time pad/cast of the weights (done at init, not per forward call).

    w1: [D, H]  (transpose of torch fc1.weight)   b1: [H]
    w2: [H, O]  (transpose of torch fc2.weight)   b2: [O]
    H and O are zero-padded to multiples of 128 (lane-dense tiles); padding is
    exact because the padded rows/cols are zeros.
    """
    D, H = w1.shape
    O = w2.shape[1]
    Hp = _round_up(H, 128)
    Op = _round_up(O, 128)
    w1p = jnp.zeros((D, Hp), compute_dtype).at[:, :H].set(w1.astype(compute_dtype))
    w2p = jnp.zeros((Hp, Op), compute_dtype).at[:H, :O].set(w2.astype(compute_dtype))
    # Biases stay f32; they are added after the f32 accumulation.
    b1p = jnp.zeros((1, Hp), jnp.float32).at[0, :H].set(b1.astype(jnp.float32))
    b2p = jnp.zeros((1, Op), jnp.float32).at[0, :O].set(b2.astype(jnp.float32))
    return w1p, b1p, w2p, b2p


def mlp_forward(x, w1p, b1p, w2p, b2p, *, tb=None, out_dtype=jnp.bfloat16,
                n_out=None):
    """Fused forward pass of MLPModel.

    x: [B, D] (any float dtype; streamed unpadded along D and cast in-kernel).
    w1p/b1p/w2p/b2p: outputs of prepare_params (padded, VMEM-resident).
    Returns [B, n_out] in out_dtype (n_out defaults to the true output size if
    it can't be inferred; pass output_size explicitly to strip O padding).
    """
    B, D = x.shape
    Dp_w, Hp = w1p.shape
    Op = w2p.shape[1]
    assert Dp_w == D, "w1p first dim must equal the x feature dim"
    if n_out is None:
        n_out = Op

    if tb is None:
        tb = _choose_tb(B)
    tb = _round_up(tb, 16)
    Bp = _round_up(B, tb)

    # Only the batch dim is ever padded (and only when B % tb != 0).
    xp = x if Bp == B else jnp.zeros((Bp, D), x.dtype).at[:B].set(x)

    grid = (Bp // tb,)

    bytes_in = (xp.size * xp.dtype.itemsize
                + w1p.size * w1p.dtype.itemsize
                + w2p.size * w2p.dtype.itemsize
                + b1p.size * 4 + b2p.size * 4)
    bytes_out = Bp * Op * jnp.dtype(out_dtype).itemsize
    cost = pl.CostEstimate(
        flops=2 * Bp * D * Hp + 2 * Bp * Hp * Op,
        transcendentals=Bp * Hp + Bp * Op,
        bytes_accessed=bytes_in + bytes_out,
    )

    out_padded = pl.pallas_call(
        mlp_kernel,
        out_shape=jax.ShapeDtypeStruct((Bp, Op), out_dtype),
        grid_spec=pltpu.PrefetchScalarGridSpec(
            num_scalar_prefetch=0,
            grid=grid,
            in_specs=[
                # x tile: last dim = full D (bypasses the 128 rule), streamed.
                pl.BlockSpec((tb, D), lambda i: (i, 0)),
                # Weights / biases: VMEM-resident across all grid steps.
                pl.BlockSpec((D, Hp), lambda i: (0, 0)),
                pl.BlockSpec((1, Hp), lambda i: (0, 0)),
                pl.BlockSpec((Hp, Op), lambda i: (0, 0)),
                pl.BlockSpec((1, Op), lambda i: (0, 0)),
            ],
            out_specs=pl.BlockSpec((tb, Op), lambda i: (i, 0)),
        ),
        compiler_params=pltpu.CompilerParams(
            dimension_semantics=("parallel",)),
        cost_estimate=cost,
    )(xp, w1p, b1p, w2p, b2p)

    return out_padded[:B, :n_out]


def init_params(key, input_size, hidden_size, output_size):
    """Deterministic init mimicking PyTorch nn.Linear defaults.

    fc1: weight U(-1/sqrt(in), 1/sqrt(in)), bias filled with 0.
    fc2: weight and bias U(-1/sqrt(in), 1/sqrt(in)); requires_grad=False on the
         bias only matters for training — the forward pass still adds it.
    Weights are stored as [in, out] (transpose of PyTorch's [out, in]).
    """
    k1, k2, k3 = jax.random.split(key, 3)
    bound1 = 1.0 / jnp.sqrt(float(input_size))
    bound2 = 1.0 / jnp.sqrt(float(hidden_size))
    w1 = jax.random.uniform(k1, (input_size, hidden_size), jnp.float32,
                            minval=-bound1, maxval=bound1)
    b1 = jnp.zeros((hidden_size,), jnp.float32)
    w2 = jax.random.uniform(k2, (hidden_size, output_size), jnp.float32,
                            minval=-bound2, maxval=bound2)
    b2 = jax.random.uniform(k3, (output_size,), jnp.float32,
                            minval=-bound2, maxval=bound2)
    return w1, b1, w2, b2


def mlp_reference(x, w1, b1, w2, b2):
    h = jnp.tanh(x @ w1 + b1)
    out = h @ w2 + b2
    return (1.0 + jnp.tanh(out)) / 2.0


if __name__ == "__main__":
    # sklearn "digits": 64 features, hidden_size=32, output_size=10.
    batch, input_size, hidden_size, output_size = 16, 64, 32, 10

    key = jax.random.PRNGKey(0)
    kx, kp = jax.random.split(key)
    x = jax.random.normal(kx, (batch, input_size), jnp.float32)
    w1, b1, w2, b2 = init_params(kp, input_size, hidden_size, output_size)

    ref = mlp_reference(x, w1, b1, w2, b2)

    # --- Full-f32 path: tight check against the JAX reference. ---
    p_f32 = prepare_params(w1, b1, w2, b2, compute_dtype=jnp.float32)
    fwd_f32 = jax.jit(
        lambda xx, a, b, c, d: mlp_forward(
            xx, a, b, c, d, out_dtype=jnp.float32, n_out=output_size))
    out_f32 = jax.block_until_ready(fwd_f32(x, *p_f32))
    assert out_f32.shape == (batch, output_size)
    assert jnp.allclose(out_f32, ref, atol=1e-5, rtol=1e-5), "f32 mismatch vs reference"

    # --- Default path: bf16 weights, in-kernel x cast, bf16 output store. ---
    p_bf16 = prepare_params(w1, b1, w2, b2)  # bf16 weights
    fwd_bf16 = jax.jit(
        lambda xx, a, b, c, d: mlp_forward(xx, a, b, c, d, n_out=output_size))
    out_bf16 = jax.block_until_ready(fwd_bf16(x, *p_bf16))
    assert out_bf16.shape == (batch, output_size)
    assert jnp.allclose(out_bf16.astype(jnp.float32), ref,
                        atol=5e-2, rtol=5e-2), "bf16 mismatch vs reference"

    print("KERNEL_OK")
</pallas_src>

<mosaic_0001>
module attributes {stable_mosaic.version = 11 : i64} {
  func.func @mlp_kernel(%arg0: i32, %arg1: memref<16x64xf32, #tpu.memory_space<vmem>>, %arg2: memref<64x128xf32, #tpu.memory_space<vmem>>, %arg3: memref<1x128xf32, #tpu.memory_space<vmem>>, %arg4: memref<128x128xf32, #tpu.memory_space<vmem>>, %arg5: memref<1x128xf32, #tpu.memory_space<vmem>>, %arg6: memref<16x128xf32, #tpu.memory_space<vmem>>) attributes {dimension_semantics = [#tpu.dimension_semantics<parallel>], iteration_bounds = array<i64: 1>, scalar_prefetch = 0 : i64, scratch_operands = 0 : i64, tpu.core_type = #tpu.core_type<tc>, window_params = [{transform_indices = @transform_0, window_bounds = array<i64: 16, 64>}, {pipeline_mode = #tpu.pipeline_mode<synchronous>, transform_indices = @transform_1, window_bounds = array<i64: 64, 128>}, {pipeline_mode = #tpu.pipeline_mode<synchronous>, transform_indices = @transform_2, window_bounds = array<i64: 1, 128>}, {pipeline_mode = #tpu.pipeline_mode<synchronous>, transform_indices = @transform_3, window_bounds = array<i64: 128, 128>}, {pipeline_mode = #tpu.pipeline_mode<synchronous>, transform_indices = @transform_4, window_bounds = array<i64: 1, 128>}, {transform_indices = @transform_5, window_bounds = array<i64: 16, 128>}]} {
    %c0 = arith.constant 0 : index
    %c0_0 = arith.constant 0 : index
    %0 = vector.load %arg1[%c0, %c0_0] : memref<16x64xf32, #tpu.memory_space<vmem>>, vector<16x64xf32>
    %c0_1 = arith.constant 0 : index
    %c0_2 = arith.constant 0 : index
    %1 = vector.load %arg2[%c0_1, %c0_2] : memref<64x128xf32, #tpu.memory_space<vmem>>, vector<64x128xf32>
    %cst = arith.constant dense<0.000000e+00> : vector<16x128xf32>
    %2 = tpu.matmul %0, %1, %cst {dimension_numbers = #tpu.dot_dimension_numbers<[1], [0], [0], [1], [0, 0, 1, 1], [], []>} : vector<16x64xf32>, vector<64x128xf32>, vector<16x128xf32> -> vector<16x128xf32>
    %c0_3 = arith.constant 0 : index
    %c0_4 = arith.constant 0 : index
    %3 = vector.load %arg3[%c0_3, %c0_4] : memref<1x128xf32, #tpu.memory_space<vmem>>, vector<1x128xf32>
    %4 = vector.broadcast %3 : vector<1x128xf32> to vector<16x128xf32>
    %5 = arith.addf %2, %4 : vector<16x128xf32>
    %6 = math.tanh %5 : vector<16x128xf32>
    %c0_5 = arith.constant 0 : index
    %c0_6 = arith.constant 0 : index
    %7 = vector.load %arg4[%c0_5, %c0_6] : memref<128x128xf32, #tpu.memory_space<vmem>>, vector<128x128xf32>
    %cst_7 = arith.constant dense<0.000000e+00> : vector<16x128xf32>
    %8 = tpu.matmul %6, %7, %cst_7 {dimension_numbers = #tpu.dot_dimension_numbers<[1], [0], [0], [1], [0, 0, 1, 1], [], []>} : vector<16x128xf32>, vector<128x128xf32>, vector<16x128xf32> -> vector<16x128xf32>
    %c0_8 = arith.constant 0 : index
    %c0_9 = arith.constant 0 : index
    %9 = vector.load %arg5[%c0_8, %c0_9] : memref<1x128xf32, #tpu.memory_space<vmem>>, vector<1x128xf32>
    %10 = vector.broadcast %9 : vector<1x128xf32> to vector<16x128xf32>
    %11 = arith.addf %8, %10 : vector<16x128xf32>
    %12 = math.tanh %11 : vector<16x128xf32>
    %cst_10 = arith.constant 1.000000e+00 : f32
    %13 = vector.broadcast %cst_10 : f32 to vector<16x128xf32>
    %14 = arith.addf %13, %12 : vector<16x128xf32>
    %cst_11 = arith.constant 5.000000e-01 : f32
    %15 = vector.broadcast %cst_11 : f32 to vector<16x128xf32>
    %16 = arith.mulf %15, %14 : vector<16x128xf32>
    %c0_12 = arith.constant 0 : index
    %c0_13 = arith.constant 0 : index
    %17 = vector.load %arg6[%c0_12, %c0_13] : memref<16x128xf32, #tpu.memory_space<vmem>>, vector<16x128xf32>
    tpu.vector_store %arg6[%c0_12, %c0_13], %16 {strides = array<i32>} : memref<16x128xf32, #tpu.memory_space<vmem>>, vector<16x128xf32>,
    return
  }
  func.func @transform_0(%arg0: i32) -> (i32, i32) {
    %c0_i32 = arith.constant 0 : i32
    %c0_i32_0 = arith.constant 0 : i32
    return %arg0, %c0_i32 : i32, i32
  }
  func.func @transform_1(%arg0: i32) -> (i32, i32) {
    %c0_i32 = arith.constant 0 : i32
    %c0_i32_0 = arith.constant 0 : i32
    %c0_i32_1 = arith.constant 0 : i32
    return %c0_i32, %c0_i32_0 : i32, i32
  }
  func.func @transform_2(%arg0: i32) -> (i32, i32) {
    %c0_i32 = arith.constant 0 : i32
    %c0_i32_0 = arith.constant 0 : i32
    %c0_i32_1 = arith.constant 0 : i32
    return %c0_i32, %c0_i32_0 : i32, i32
  }
  func.func @transform_3(%arg0: i32) -> (i32, i32) {
    %c0_i32 = arith.constant 0 : i32
    %c0_i32_0 = arith.constant 0 : i32
    %c0_i32_1 = arith.constant 0 : i32
    return %c0_i32, %c0_i32_0 : i32, i32
  }
  func.func @transform_4(%arg0: i32) -> (i32, i32) {
    %c0_i32 = arith.constant 0 : i32
    %c0_i32_0 = arith.constant 0 : i32
    %c0_i32_1 = arith.constant 0 : i32
    return %c0_i32, %c0_i32_0 : i32, i32
  }
  func.func @transform_5(%arg0: i32) -> (i32, i32) {
    %c0_i32 = arith.constant 0 : i32
    %c0_i32_0 = arith.constant 0 : i32
    return %arg0, %c0_i32 : i32, i32
  }
}

</mosaic_0001>

<bundles_post_ra>
// kernel: _lambda_.1
= control target key start
LH: loop header
LB: loop body
LE: loop exit
PB: predicated region body
PF: predicated region fallthrough
CT: control target
= control target key end

     0   :  { %10 = vsyncpa [#allocation3], 0  ;;  %s640_s0 = inlined_call_operand.hbm [shape: f32[16,64], index: 0, kind: input, shape index: {}]   ;;  %s641_s1 = inlined_call_operand.hbm [shape: f32[64,128], index: 1, kind: input, shape index: {}]   ;;  %s642_s2 = inlined_call_operand.vmem [shape: f32[1,128], index: 2, kind: input, shape index: {}]   ;;  %s643_s3 = inlined_call_operand.hbm [shape: f32[128,128], index: 3, kind: input, shape index: {}]   ;;  %s644_s4 = inlined_call_operand.vmem [shape: f32[1,128], index: 4, kind: input, shape index: {}]   ;;  %s645_s5 = inlined_call_operand.hbm [shape: f32[16,128], index: 5, kind: output, shape index: {}]  }
   0x1   :  { %11 = vsyncpa [#allocation6], 0 }
   0x2   :  { %12 = vsyncpa [#allocation4], 0  ;;  %s529_s18 = smov [#allocation5]   ;;  %s530_s20 = smov [#allocation2]  }
   0x3   :  { %s30_s19 = sshll.u32 %s529_s18, 4  ;;  %s18_s21 = sshll.u32 %s530_s20, 4  ;;  %s31_s19 = int_to_ptr.vmem [resolvable:$true] %s30_s19  ;;  %s565_s21 = int_to_ptr.vmem [resolvable:$true] %s18_s21 }
   0x4   :  { %s435_s24 = scalar_lea.hbm %s641_s1, 1024 }
   0x5   :  { %p436_p0 = scmp.ne.s32.totalorder %s641_s1, %s435_s24  ;;  %p439_p1 = scmp.lt.u32.totalorder %s435_s24, %s641_s1 }
   0x7   :  { %p441_p2 = pnand %p439_p1, %p436_p0 }
   0x9   :  { %444 = shalt.err (!%p441_p2)
}
   0xa   :  { %s445_s29 = scalar_lea.vmem %s31_s19, 1024  ;;  %p450_p4 = scmp.lt.s32.totalorder %s31_s19, %s31_s19 }
   0xb   :  { %p446_p3 = scmp.ne.s32.totalorder %s31_s19, %s445_s29  ;;  %p451_p5 = scmp.lt.s32.totalorder %s445_s29, %s445_s29 }
   0xd   :  { %p452_p6 = por %p451_p5, %p450_p4 }
   0xf   :  { %p453_p7 = pnand %p452_p6, %p446_p3 }
  0x11   :  { %456 = shalt.err (!%p453_p7)
}
  0x12   :  { %s531_s30 = smov 128   ;;  %s532_s6 = smov 8  }
  0x13   :  { %36 = dma.hbm_to_vmem [thread:$0]  %s641_s1, 1024, %s31_s19, [#allocation6], %s531_s30, %s531_s30, %s532_s6  }
  0x14   :  { %s457_s11 = scalar_lea.hbm %s640_s0, 256 }
  0x15   :  { %p458_p8 = scmp.ne.s32.totalorder %s640_s0, %s457_s11  ;;  %p461_p9 = scmp.lt.u32.totalorder %s457_s11, %s640_s0 }
  0x17   :  { %p463_p10 = pnand %p461_p9, %p458_p8 }
  0x19   :  { %466 = shalt.err (!%p463_p10)
}
  0x1a   :  { %s467_s16 = scalar_lea.vmem %s565_s21, 256  ;;  %p472_p12 = scmp.lt.s32.totalorder %s565_s21, %s565_s21 }
  0x1b   :  { %p468_p11 = scmp.ne.s32.totalorder %s565_s21, %s467_s16  ;;  %p473_p13 = scmp.lt.s32.totalorder %s467_s16, %s467_s16 }
  0x1d   :  { %p474_p0 = por %p473_p13, %p472_p12 }
  0x1f   :  { %p475_p1 = pnand %p474_p0, %p468_p11 }
  0x21   :  { %478 = shalt.err (!%p475_p1)
}
  0x22   :  { %24 = dma.hbm_to_vmem [thread:$0]  %s640_s0, 256, %s565_s21, [#allocation3], %s531_s30, %s531_s30, %s532_s6  }
  0x23   :  { %s533_s18 = smov [#allocation7]   ;;  %s479_s23 = scalar_lea.hbm %s643_s3, 2048 }
  0x24   :  { %s44_s19 = sshll.u32 %s533_s18, 4  ;;  %p480_p2 = scmp.ne.s32.totalorder %s643_s3, %s479_s23  ;;  %s45_s19 = int_to_ptr.vmem [resolvable:$true] %s44_s19 }
  0x25   :  { %p483_p3 = scmp.lt.u32.totalorder %s479_s23, %s643_s3 }
  0x27   :  { %p485_p4 = pnand %p483_p3, %p480_p2 }
  0x29   :  { %488 = shalt.err (!%p485_p4)
}
  0x2a   :  { %s489_s28 = scalar_lea.vmem %s45_s19, 2048  ;;  %p494_p6 = scmp.lt.s32.totalorder %s45_s19, %s45_s19 }
  0x2b   :  { %p490_p5 = scmp.ne.s32.totalorder %s45_s19, %s489_s28  ;;  %p495_p7 = scmp.lt.s32.totalorder %s489_s28, %s489_s28 }
  0x2d   :  { %p496_p8 = por %p495_p7, %p494_p6 }
  0x2f   :  { %p497_p9 = pnand %p496_p8, %p490_p5 }
  0x31   :  { %500 = shalt.err (!%p497_p9)
}
  0x32   :  { %50 = dma.hbm_to_vmem [thread:$0]  %s643_s3, 2048, %s45_s19, [#allocation6], %s531_s30, %s531_s30, %s532_s6  }
  0x33   :  { %523 = dma.done.wait [#allocation3], 256  }
  0x34   :  { %524 = vsyncadd [#allocation3], 4294967040 }
  0x35   :  { %525 = dma.done.wait [#allocation6], 3072  }
  0x36   :  { %526 = vsyncadd [#allocation6], 4294964224  ;;  %v64_v0 = vld [vmem:[#allocation5] sm:$0xff]  ;;  %v65_v1 = vld [vmem:[#allocation5 + $0x8] sm:$0xff]  ;;  %vm79_vm0 = vcmask 523264  }
  0x37   :  { %v66_v2 = vld [vmem:[#allocation5 + $0x10] sm:$0xff]  ;;  %v373_v3 = vpack.c.bf16 %v65_v1, %v64_v0  ;;  %v67_v4 = vld [vmem:[#allocation5 + $0x18] sm:$0xff]  ;;  %v68_v6 = vld [vmem:[#allocation5 + $0x20] sm:$0xff] }
  0x38   :  { %v377_v5 = vpack.c.bf16 %v67_v4, %v66_v2  ;;  %v69_v7 = vld [vmem:[#allocation5 + $0x28] sm:$0xff]  ;;  %v62_v8 = vld [vmem:[#allocation2] sm:$0xff]  ;;  %v163_v9 = vld [vmem:[#allocation7] sm:$0xff] }
  0x39   :  { %374 = vmatprep.subr.bf16.mxu0 %v373_v3  ;;  %335 = vmatprep.mubr.msk.f32.mxu0 %vm79_vm0, %v62_v8  ;;  %v164_v10 = vld [vmem:[#allocation7 + $0x8] sm:$0xff]  ;;  %v165_v12 = vld [vmem:[#allocation7 + $0x10] sm:$0xff]  ;;  %v166_v13 = vld [vmem:[#allocation7 + $0x18] sm:$0xff]  ;;  %v381_v14 = vpack.c.bf16 %v69_v7, %v68_v6 }
  0x3a   :  { %376 = vmatpush3.bf16.msra.mxu0 %v373_v3  ;;  %v389_v11 = vpack.c.bf16 %v164_v10, %v163_v9  ;;  %v393_v15 = vpack.c.bf16 %v166_v13, %v165_v12  ;;  %v167_v16 = vld [vmem:[#allocation7 + $0x20] sm:$0xff]  ;;  %v168_v17 = vld [vmem:[#allocation7 + $0x28] sm:$0xff]  ;;  %v70_v18 = vld [vmem:[#allocation5 + $0x30] sm:$0xff] }
  0x3b   :  { %378 = vmatprep.subr.bf16.mxu0 %v377_v5  ;;  %v71_v19 = vld [vmem:[#allocation5 + $0x38] sm:$0xff]  ;;  %v397_v20 = vpack.c.bf16 %v168_v17, %v167_v16  ;;  %v169_v22 = vld [vmem:[#allocation7 + $0x30] sm:$0xff]  ;;  %v171_v26 = vld [vmem:[#allocation7 + $0x40] sm:$0xff] }
  0x3c   :  { %390 = vmatprep.subr.bf16.mxu1 %v389_v11  ;;  %v385_v21 = vpack.c.bf16 %v71_v19, %v70_v18  ;;  %v170_v23 = vld [vmem:[#allocation7 + $0x38] sm:$0xff]  ;;  %v172_v27 = vld [vmem:[#allocation7 + $0x48] sm:$0xff]  ;;  %v173_v29 = vld [vmem:[#allocation7 + $0x50] sm:$0xff] }
  0x3d   :  { %392 = vmatpush3.bf16.msra.mxu1 %v389_v11  ;;  %v401_v24 = vpack.c.bf16 %v170_v23, %v169_v22  ;;  %v63_v25 = vld [vmem:[#allocation2 + $0x8] sm:$0xff]  ;;  %v405_v28 = vpack.c.bf16 %v172_v27, %v171_v26  ;;  %v175_v32 = vld [vmem:[#allocation7 + $0x60] sm:$0xff]  ;;  %v176_v33 = vld [vmem:[#allocation7 + $0x68] sm:$0xff] }
  0x3e   :  { %380 = vmatpush3.bf16.msra.mxu0 %v377_v5  ;;  %394 = vmatprep.subr.bf16.mxu1 %v393_v15  ;;  %v174_v30 = vld [vmem:[#allocation7 + $0x58] sm:$0xff]  ;;  %v177_v34 = vld [vmem:[#allocation7 + $0x70] sm:$0xff]  ;;  %v413_v35 = vpack.c.bf16 %v176_v33, %v175_v32 }
  0x3f   :  { %382 = vmatprep.subr.bf16.mxu0 %v381_v14  ;;  %v409_v31 = vpack.c.bf16 %v174_v30, %v173_v29  ;;  %v178_v36 = vld [vmem:[#allocation7 + $0x78] sm:$0xff]  ;;  %v287_v38 = vld [vmem:[%s642_s2] ss:$0 sm:$0xff]  ;;  %s534_s2 = smov [#allocation8]  }
  0x40   :  { %v417_v37 = vpack.c.bf16 %v178_v36, %v177_v34  ;;  %v290_v45 = vld [vmem:[%s644_s4] ss:$0 sm:$0xff]  ;;  %s274_s9 = sshll.u32 %s534_s2, 4  ;;  %s275_s9 = int_to_ptr.vmem [resolvable:$true] %s274_s9 }
  0x41   :  { %396 = vmatpush3.bf16.msra.mxu1 %v393_v15  ;;  %s501_s10 = scalar_lea.vmem %s275_s9, 256  ;;  %p506_p11 = scmp.lt.s32.totalorder %s275_s9, %s275_s9 }
  0x42   :  { %384 = vmatpush3.bf16.msra.mxu0 %v381_v14  ;;  %398 = vmatprep.subr.bf16.mxu1 %v397_v20  ;;  %p502_p10 = scmp.ne.s32.totalorder %s275_s9, %s501_s10  ;;  %p507_p12 = scmp.lt.s32.totalorder %s501_s10, %s501_s10 }
  0x43   :  { %386 = vmatprep.subr.bf16.mxu0 %v385_v21 }
  0x44   :  { %p508_p13 = por %p507_p12, %p506_p11 }
  0x45   :  { %400 = vmatpush3.bf16.msra.mxu1 %v397_v20 }
  0x46   :  { %388 = vmatpush3.bf16.msra.mxu0 %v385_v21  ;;  %402 = vmatprep.subr.bf16.mxu1 %v401_v24  ;;  %p509_p0 = pnand %p508_p13, %p502_p10 }
  0x49   :  { %336 = vmatmul.mubr.msk.f32.vlgmr.msra.gmra.mrb[0].mxu0 %vm79_vm0, %v63_v25  ;;  %404 = vmatpush3.bf16.msra.mxu1 %v401_v24 }
  0x4a   :  { %406 = vmatprep.subr.bf16.mxu1 %v405_v28 }
  0x4d   :  { %408 = vmatpush3.bf16.msra.mxu1 %v405_v28 }
  0x4e   :  { %410 = vmatprep.subr.bf16.mxu1 %v409_v31 }
  0x51   :  { %412 = vmatpush3.bf16.msra.mxu1 %v409_v31 }
  0x52   :  { %414 = vmatprep.subr.bf16.mxu1 %v413_v35 }
  0x55   :  { %416 = vmatpush3.bf16.msra.mxu1 %v413_v35 }
  0x56   :  { %418 = vmatprep.subr.bf16.mxu1 %v417_v37 }
  0x59   :  { %420 = vmatpush3.bf16.msra.mxu1 %v417_v37 }
 0x11c   :  { %v337_v39 = vpop.f32.mrb[0].mxu0 }
 0x11d   :  { %v158_v40 = vadd.f32 %v337_v39, %v287_v38  ;;  %v152_v41 = vpop.f32.mrb[1].mxu0 }
 0x11e   :  { %v153_v42 = vadd.f32 %v287_v38, %v152_v41 }
 0x120   :  { %427 = vtanh.f32 %v153_v42 }
 0x121   :  { %429 = vtanh.f32 %v158_v40 }
 0x12a   :  { %v428_v43 = vpop.eup %427 }
 0x12b   :  { %v430_v44 = vpop.eup %429  ;;  %370 = vmatprep.mubr.f32.mxu1 %v428_v43 }
 0x12c   :  { %371 = vmatmul.mubr.f32.vlgmr.msra.gmra.mrb[0].mxu1 %v430_v44 }
 0x1ff   :  { %v372_v46 = vpop.f32.mrb[0].mxu1 }
 0x200   :  { %v258_v47 = vadd.f32 %v372_v46, %v290_v45  ;;  %v252_v48 = vpop.f32.mrb[1].mxu1 }
 0x201   :  { %v253_v49 = vadd.f32 %v290_v45, %v252_v48 }
 0x202   :  { %431 = vtanh.f32 %v258_v47 }
 0x203   :  { %433 = vtanh.f32 %v253_v49 }
 0x20c   :  { %v432_v50 = vpop.eup %431 }
 0x20d   :  { %v434_v51 = vpop.eup %433  ;;  %v264_v52 = vadd.f32 1.0, %v432_v50 }
 0x20e   :  { %v263_v53 = vadd.f32 1.0, %v434_v51 }
 0x20f   :  { %v266_v54 = vmul.f32 0.5, %v264_v52 }
 0x210   :  { %v265_v55 = vmul.f32 0.5, %v263_v53 }
 0x211   :  { %268 = vst [vmem:[#allocation8 + $0x8] sm:$0xff] %v266_v54 }
 0x212   :  { %267 = vst [vmem:[#allocation8] sm:$0xff] %v265_v55 }
 0x213   :  { %512 = shalt.err (!%p509_p0)
}
 0x214   :  { %s513_s12 = scalar_lea.hbm %s645_s5, 256 }
 0x215   :  { %p514_p1 = scmp.ne.s32.totalorder %s645_s5, %s513_s12  ;;  %p517_p2 = scmp.lt.u32.totalorder %s513_s12, %s645_s5 }
 0x217   :  { %p519_p3 = pnand %p517_p2, %p514_p1 }
 0x219   :  { %522 = shalt.err (!%p519_p3)
}
 0x21a   :  { %280 = dma.vmem_to_hbm [thread:$0]  %s275_s9, 256, %s645_s5, [#allocation4], %s531_s30, %s531_s30, %s532_s6  }
 0x21b   :  { %527 = dma.done.wait [#allocation4], 256  }
 0x21c   :  { %528 = vsyncadd [#allocation4], 4294967040 }
 0x21d   :  { %284 = vsyncpa [#allocation3], 1 }
 0x21e   :  { %285 = vsyncpa [#allocation6], 1 }
 0x21f   :  { %286 = vsyncpa [#allocation4], 1 }

</bundles_post_ra>
